<compile_context>
chip_gen: v5e
topology: v5e:2x2
jax: 0.10.0
libtpu: 0.0.40
codegen_flags: <defaults>
</compile_context>

<pallas_src>
import functools

import jax
import jax.numpy as jnp
from jax.experimental import pallas as pl
from jax.experimental.pallas import tpu as pltpu


def _focal_kernel(logits_ref, target_ref, loss_ref, *, gamma, num_classes):
    # Cast to f32 only inside the kernel (HBM-resident dtype may be bf16).
    logits = logits_ref[...].astype(jnp.float32)   # (R, C)
    tgt = target_ref[...].astype(jnp.float32)      # (R, C)

    # torch.argmax(target, dim=-1) with first-occurrence tie-breaking:
    # lane max, then the minimum lane index attaining it.
    iota = jax.lax.broadcasted_iota(jnp.int32, tgt.shape, 1)          # (R, C)
    t_max = jnp.max(tgt, axis=-1, keepdims=True)                      # (R, 1)
    idx = jnp.min(jnp.where(tgt == t_max, iota, num_classes),
                  axis=-1, keepdims=True)                             # (R, 1)

    # Logit at the target class via a one-hot masked lane reduction.
    picked = jnp.sum(jnp.where(iota == idx, logits, 0.0),
                     axis=-1, keepdims=True)                          # (R, 1)

    # Numerically stable log-sum-exp over the class (lane) axis.
    m = jnp.max(logits, axis=-1, keepdims=True)
    lse = m + jnp.log(jnp.sum(jnp.exp(logits - m), axis=-1, keepdims=True))

    # Per-row cross entropy and focal weighting (mirrors the torch forward).
    loss = lse - picked                                               # (R, 1)
    w = 1.0 - jnp.exp(-loss)                                          # 1 - p
    g_int = int(gamma)
    if float(gamma) == float(g_int) and 0 <= g_int <= 8:
        # Integer gamma (the common case, e.g. 2.0): repeated VPU multiply
        # instead of a pow() (log/exp pair) on the EUP.
        fw = jnp.ones_like(w)
        for _ in range(g_int):
            fw = fw * w
    else:
        fw = jnp.power(jnp.maximum(w, 0.0), gamma)

    # TODO(synk): a lane-dense (1, R) output would avoid masked vst on the
    # reduced column, but needs a sublane->lane relayout; kept as an (R, 1)
    # column store since output traffic is only ~1/(2C) of the input stream.
    loss_ref[...] = loss * fw


def _choose_rows_per_block(N, C, in_bytes):
    """Largest row tile whose modelled VMEM working set fits ~30 MiB."""
    # Min sublane multiple per packed dtype (f32: 8, bf16: 16, 8-bit: 32).
    sub = 8 if in_bytes >= 4 else (16 if in_bytes == 2 else 32)
    if N <= sub:
        return N, sub  # single full-extent block (block == array dims is legal)
    # Conservative per-row VMEM model with lane padding to 128:
    #   2 inputs x 2 pipeline buffers (input dtype)
    # + ~5 live f32 (R, C) temporaries inside the kernel body
    # + 2 lane-padded (R, 1) output buffers (~512 B/row each for f32 tiling).
    c_pad = ((C + 127) // 128) * 128
    per_row = c_pad * (4 * in_bytes + 5 * 4) + 1024
    budget = 30 * 1024 * 1024
    r = min(8192, max(sub, budget // per_row))
    # Keep a reasonably long grid for large N so both TensorCores get work.
    if N >= 16 * sub:
        r = min(r, max(sub, pl.cdiv(N, 8)))
    r = max(sub, (r // sub) * sub)          # multiple of the sublane tile
    r = min(r, max(sub, (N // sub) * sub))  # never larger than the array
    return int(r), sub


def focal_loss(output, target, gamma, *, rows_per_block=None):
    """output, target: (B, S, C). Returns focal loss of shape (B, S), f32."""
    B, S, C = output.shape
    N = B * S

    # Row-major flatten of the leading dims is free (no data movement).
    logits2d = output.reshape(N, C)
    target2d = target.reshape(N, C)

    in_bytes = max(jnp.dtype(output.dtype).itemsize,
                   jnp.dtype(target.dtype).itemsize)
    auto_r, _ = _choose_rows_per_block(N, C, in_bytes)
    R = auto_r if rows_per_block is None else rows_per_block
    grid = pl.cdiv(N, R)

    # Explicit VMEM budget sized to the chosen tile (double-buffered inputs +
    # f32 temporaries + lane-padded output buffers), capped v7x-safe (<64 MiB).
    c_pad = ((C + 127) // 128) * 128
    est = R * (c_pad * (4 * in_bytes + 5 * 4) + 1024)
    vmem_limit = int(min(48 * 1024 * 1024,
                         max(32 * 1024 * 1024, (3 * est) // 2)))

    kernel = functools.partial(_focal_kernel, gamma=float(gamma), num_classes=C)

    # TODO(synk): if targets are one-hot upstream, accept int32 class indices
    # (SMEM / scalar prefetch) instead of the full (N, C) score tensor to halve
    # HBM read traffic; the module's interface here is soft (B, S, C) targets.
    loss2d = pl.pallas_call(
        kernel,
        out_shape=jax.ShapeDtypeStruct((N, 1), jnp.float32),
        grid=(grid,),
        in_specs=[
            pl.BlockSpec((R, C), lambda i: (i, 0)),
            pl.BlockSpec((R, C), lambda i: (i, 0)),
        ],
        out_specs=pl.BlockSpec((R, 1), lambda i: (i, 0)),
        compiler_params=pltpu.CompilerParams(
            dimension_semantics=("parallel",),
            vmem_limit_bytes=vmem_limit,
        ),
    )(logits2d, target2d)

    return loss2d.reshape(B, S)


def _focal_loss_ref(output, target, gamma):
    # Pure-JAX reference mirroring the PyTorch forward.
    tgt_idx = jnp.argmax(target, axis=2)                          # (B, S)
    logp = jax.nn.log_softmax(output.astype(jnp.float32), axis=2)
    loss = -jnp.take_along_axis(logp, tgt_idx[..., None], axis=2)[..., 0]
    probs = jnp.exp(-loss)
    return loss * jnp.power(1.0 - probs, gamma)


if __name__ == "__main__":
    gamma = 2.0
    key = jax.random.PRNGKey(0)
    k1, k2, k3, k4 = jax.random.split(key, 4)

    # Small shape consistent with the module: (batch, seq, classes).
    B, S, C = 2, 8, 16
    output = jax.random.normal(k1, (B, S, C), dtype=jnp.float32)
    target = jax.random.uniform(k2, (B, S, C), dtype=jnp.float32)

    loss = focal_loss(output, target, gamma)
    jax.block_until_ready(loss)
    ref = _focal_loss_ref(output, target, gamma)
    if loss.shape != (B, S):
        raise AssertionError(f"bad output shape {loss.shape}")
    if not jnp.allclose(loss, ref, atol=1e-5, rtol=1e-5):
        raise AssertionError("Pallas focal loss mismatch vs reference (small)")

    # Ragged shape exercising the pl.cdiv grid / partial last block path.
    B2, S2, C2 = 2, 83, 10
    output2 = jax.random.normal(k3, (B2, S2, C2), dtype=jnp.float32)
    target2 = jax.random.uniform(k4, (B2, S2, C2), dtype=jnp.float32)

    loss2 = focal_loss(output2, target2, gamma)
    jax.block_until_ready(loss2)
    ref2 = _focal_loss_ref(output2, target2, gamma)
    if not jnp.allclose(loss2, ref2, atol=1e-5, rtol=1e-5):
        raise AssertionError("Pallas focal loss mismatch vs reference (ragged)")

    print("KERNEL_OK")
</pallas_src>

<mosaic_0001>
module attributes {stable_mosaic.version = 11 : i64} {
  func.func @_focal_kernel(%arg0: i32, %arg1: memref<16x16xf32, #tpu.memory_space<vmem>>, %arg2: memref<16x16xf32, #tpu.memory_space<vmem>>, %arg3: memref<16x1xf32, #tpu.memory_space<vmem>>) attributes {dimension_semantics = [#tpu.dimension_semantics<parallel>], iteration_bounds = array<i64: 1>, scalar_prefetch = 0 : i64, scratch_operands = 0 : i64, tpu.core_type = #tpu.core_type<tc>, window_params = [{transform_indices = @transform_0, window_bounds = array<i64: 16, 16>}, {transform_indices = @transform_1, window_bounds = array<i64: 16, 16>}, {transform_indices = @transform_2, window_bounds = array<i64: 16, 1>}]} {
    %c0 = arith.constant 0 : index
    %c0_0 = arith.constant 0 : index
    %0 = vector.load %arg1[%c0, %c0_0] : memref<16x16xf32, #tpu.memory_space<vmem>>, vector<16x16xf32>
    %c0_1 = arith.constant 0 : index
    %c0_2 = arith.constant 0 : index
    %1 = vector.load %arg2[%c0_1, %c0_2] : memref<16x16xf32, #tpu.memory_space<vmem>>, vector<16x16xf32>
    %2 = tpu.iota {dimensions = array<i32: 1>} : vector<16x16xi32>
    %cst = arith.constant dense<0xFF800000> : vector<16xf32>
    %3 = vector.multi_reduction <maximumf>, %1, %cst [1] : vector<16x16xf32> to vector<16xf32>
    %4 = vector.shape_cast %3 : vector<16xf32> to vector<16x1xf32>
    %5 = vector.broadcast %4 : vector<16x1xf32> to vector<16x16xf32>
    %6 = arith.cmpf oeq, %1, %5 : vector<16x16xf32>
    %c16_i32 = arith.constant 16 : i32
    %7 = vector.broadcast %c16_i32 : i32 to vector<16x16xi32>
    %8 = arith.select %6, %2, %7 : vector<16x16xi1>, vector<16x16xi32>
    %cst_3 = arith.constant dense<2147483647> : vector<16xi32>
    %9 = vector.multi_reduction <minsi>, %8, %cst_3 [1] : vector<16x16xi32> to vector<16xi32>
    %10 = vector.shape_cast %9 : vector<16xi32> to vector<16x1xi32>
    %11 = vector.broadcast %10 : vector<16x1xi32> to vector<16x16xi32>
    %12 = arith.cmpi eq, %2, %11 : vector<16x16xi32>
    %cst_4 = arith.constant 0.000000e+00 : f32
    %13 = vector.broadcast %cst_4 : f32 to vector<16x16xf32>
    %14 = arith.select %12, %0, %13 : vector<16x16xi1>, vector<16x16xf32>
    %cst_5 = arith.constant dense<0.000000e+00> : vector<16xf32>
    %15 = vector.multi_reduction <add>, %14, %cst_5 [1] : vector<16x16xf32> to vector<16xf32>
    %16 = vector.shape_cast %15 : vector<16xf32> to vector<16x1xf32>
    %cst_6 = arith.constant dense<0xFF800000> : vector<16xf32>
    %17 = vector.multi_reduction <maximumf>, %0, %cst_6 [1] : vector<16x16xf32> to vector<16xf32>
    %18 = vector.shape_cast %17 : vector<16xf32> to vector<16x1xf32>
    %19 = vector.broadcast %18 : vector<16x1xf32> to vector<16x16xf32>
    %20 = arith.subf %0, %19 : vector<16x16xf32>
    %21 = math.exp %20 : vector<16x16xf32>
    %cst_7 = arith.constant dense<0.000000e+00> : vector<16xf32>
    %22 = vector.multi_reduction <add>, %21, %cst_7 [1] : vector<16x16xf32> to vector<16xf32>
    %23 = vector.shape_cast %22 : vector<16xf32> to vector<16x1xf32>
    %24 = math.log %23 : vector<16x1xf32>
    %25 = arith.addf %18, %24 : vector<16x1xf32>
    %26 = arith.subf %25, %16 : vector<16x1xf32>
    %cst_8 = arith.constant 0.000000e+00 : f32
    %27 = vector.broadcast %cst_8 : f32 to vector<16x1xf32>
    %28 = arith.subf %27, %26 : vector<16x1xf32>
    %29 = math.exp %28 : vector<16x1xf32>
    %cst_9 = arith.constant 1.000000e+00 : f32
    %30 = vector.broadcast %cst_9 : f32 to vector<16x1xf32>
    %31 = arith.subf %30, %29 : vector<16x1xf32>
    %cst_10 = arith.constant 1.000000e+00 : f32
    %32 = vector.broadcast %cst_10 : f32 to vector<16x1xf32>
    %33 = arith.mulf %32, %31 : vector<16x1xf32>
    %34 = arith.mulf %33, %31 : vector<16x1xf32>
    %35 = arith.mulf %26, %34 : vector<16x1xf32>
    %c0_11 = arith.constant 0 : index
    %c0_12 = arith.constant 0 : index
    %36 = vector.load %arg3[%c0_11, %c0_12] : memref<16x1xf32, #tpu.memory_space<vmem>>, vector<16x1xf32>
    tpu.vector_store %arg3[%c0_11, %c0_12], %35 {strides = array<i32>} : memref<16x1xf32, #tpu.memory_space<vmem>>, vector<16x1xf32>,
    return
  }
  func.func @transform_0(%arg0: i32) -> (i32, i32) {
    %c0_i32 = arith.constant 0 : i32
    %c0_i32_0 = arith.constant 0 : i32
    return %arg0, %c0_i32 : i32, i32
  }
  func.func @transform_1(%arg0: i32) -> (i32, i32) {
    %c0_i32 = arith.constant 0 : i32
    %c0_i32_0 = arith.constant 0 : i32
    return %arg0, %c0_i32 : i32, i32
  }
  func.func @transform_2(%arg0: i32) -> (i32, i32) {
    %c0_i32 = arith.constant 0 : i32
    %c0_i32_0 = arith.constant 0 : i32
    return %arg0, %c0_i32 : i32, i32
  }
}

</mosaic_0001>

<bundles_post_ra>
// kernel: tpu_custom_call.1
= control target key start
LH: loop header
LB: loop body
LE: loop exit
PB: predicated region body
PF: predicated region fallthrough
CT: control target
= control target key end

     0   :  { %7 = vsyncpa [#allocation3], 0  ;;  %s260_s0 = inlined_call_operand.hbm [shape: f32[16,16], index: 0, kind: input, shape index: {}]   ;;  %s261_s1 = inlined_call_operand.hbm [shape: f32[16,16], index: 1, kind: input, shape index: {}]   ;;  %s262_s2 = inlined_call_operand.vmem [shape: f32[16,1], index: 2, kind: output, shape index: {}]  }
   0x1   :  { %s13_s11 = sshll.u32 %s260_s0, 4  ;;  %s14_s11 = int_to_ptr.hbm [resolvable:$true] %s13_s11 }
   0x2   :  { %8 = vsyncpa [#allocation5], 0  ;;  %s215_s12 = smov [#allocation2]   ;;  %s26_s16 = sshll.u32 %s261_s1, 4  ;;  %s27_s16 = int_to_ptr.hbm [resolvable:$true] %s26_s16 }
   0x3   :  { %s15_s13 = sshll.u32 %s215_s12, 4  ;;  %s216_s17 = smov 128   ;;  %s16_s13 = int_to_ptr.vmem [resolvable:$true] %s15_s13 }
   0x4   :  { %s217_s18 = smov 8   ;;  %s218_s19 = smov [#allocation4]  }
   0x5   :  { %21 = dma.hbm_to_vmem [thread:$0]  %s14_s11, 256, %s16_s13, [#allocation3], %s216_s17, %s216_s17, %s217_s18  }
   0x6   :  { %s28_s20 = sshll.u32 %s218_s19, 4  ;;  %s29_s20 = int_to_ptr.vmem [resolvable:$true] %s28_s20 }
   0x7   :  { %34 = dma.hbm_to_vmem [thread:$0]  %s27_s16, 256, %s29_s20, [#allocation5], %s216_s17, %s216_s17, %s217_s18  }
   0x8   :  { %211 = dma.done.wait [#allocation3], 256  }
   0x9   :  { %212 = vsyncadd [#allocation3], 4294967040 }
   0xa   :  { %213 = dma.done.wait [#allocation5], 256  }
   0xb   :  { %214 = vsyncadd [#allocation5], 4294967040  ;;  %vm49_vm0 = vcmask 130048   ;;  %v45_v0 = vld [vmem:[#allocation4] sm:$0xff]  ;;  %v43_v1 = vld [vmem:[#allocation2] sm:$0xff]  ;;  %v47_v8 = vlaneseq  ;;  %vm138_vm7 = vcmask 7168  }
   0xc   :  { %v50_v2 = vsel %vm49_vm0, %v45_v0, -inf  ;;  %v100_v3 = vsel %vm49_vm0, %v43_v1, -inf  ;;  %v46_v4 = vld [vmem:[#allocation4 + $0x8] sm:$0xff]  ;;  %v44_v6 = vld [vmem:[#allocation2 + $0x8] sm:$0xff] }
   0xd   :  { %51 = vmax.xlane.f32.xlu0 %v50_v2  ;;  %101 = vmax.xlane.f32.xlu2 %v100_v3  ;;  %v53_v5 = vsel %vm49_vm0, %v46_v4, -inf  ;;  %v103_v7 = vsel %vm49_vm0, %v44_v6, -inf  ;;  %v48_v9 = vand.u32 127, %v47_v8 }
  0x15   :  { %54 = vmax.xlane.f32.xlu0 %v53_v5  ;;  %104 = vmax.xlane.f32.xlu2 %v103_v7 }
  0x80   :  { %v52_v10 = vpop.xlane.xlu0 %51  ;;  %v244_v11 = vpop.xlane.xlu2 %101 }
  0x81   :  { %vm56_vm1 = vcmp.eq.f32.partialorder %v45_v0, %v52_v10  ;;  %v106_v12 = vsub.f32 %v43_v1, %v244_v11 }
  0x82   :  { %v58_v13 = vsel %vm56_vm1, %v48_v9, 16 }
  0x83   :  { %v60_v14 = vsel %vm49_vm0, %v58_v13, 2147483647  ;;  %v108_v15 = vmul.f32 1.442695, %v106_v12 }
  0x84   :  { %v62_v16 = vshra.s32 %v60_v14, 16  ;;  %v61_v28 = vand.u32 65535, %v60_v14 }
  0x85   :  { %151 = vpow2.f32 %v108_v15 }
  0x86   :  { %v64_v17 = vcvt.s32.f32 %v62_v16  ;;  %v63_v30 = vcvt.s32.f32 %v61_v28 }
  0x88   :  { %65 = vmin.xlane.f32.xlu1 %v64_v17  ;;  %v55_v18 = vpop.xlane.xlu0 %54  ;;  %v105_v25 = vpop.xlane.xlu2 %104 }
  0x89   :  { %vm57_vm2 = vcmp.eq.f32.partialorder %v46_v4, %v55_v18  ;;  %v107_v26 = vsub.f32 %v44_v6, %v105_v25 }
  0x8a   :  { %v59_v19 = vsel %vm57_vm2, %v48_v9, 16 }
  0x8b   :  { %v152_v20 = vpop.eup %151  ;;  %v75_v21 = vsel %vm49_vm0, %v59_v19, 2147483647  ;;  %v110_v27 = vmul.f32 1.442695, %v107_v26 }
  0x8c   :  { %v77_v22 = vshra.s32 %v75_v21, 16  ;;  %v112_v23 = vsel %vm49_vm0, %v152_v20, 0.0  ;;  %v76_v32 = vand.u32 65535, %v75_v21 }
  0x8d   :  { %113 = vadd.xlane.f32.xlu2 %v112_v23  ;;  %153 = vpow2.f32 %v110_v27 }
  0x8e   :  { %v79_v24 = vcvt.s32.f32 %v77_v22  ;;  %v78_v35 = vcvt.s32.f32 %v76_v32 }
  0x90   :  { %80 = vmin.xlane.f32.xlu1 %v79_v24 }
  0x93   :  { %v154_v33 = vpop.eup %153 }
  0x94   :  { %v115_v36 = vsel %vm49_vm0, %v154_v33, 0.0 }
  0xfb   :  { %v66_v29 = vpop.xlane.xlu1 %65 }
  0xfc   :  { %vm67_vm3 = vcmp.eq.f32.partialorder %v64_v17, %v66_v29  ;;  %v72_v38 = vcvt.f32.s32 %v66_v29 }
  0xfd   :  { %v68_v31 = vsel %vm67_vm3, %v63_v30, inf }
  0xfe   :  { %69 = vmin.xlane.f32.xlu0 %v68_v31  ;;  %v73_v40 = vshll.u32 %v72_v38, 16 }
 0x100   :  { %v114_v52 = vpop.xlane.xlu2 %113 }
 0x101   :  { %155 = vlog2.f32 %v114_v52 }
 0x103   :  { %v81_v34 = vpop.xlane.xlu1 %80 }
 0x104   :  { %vm82_vm4 = vcmp.eq.f32.partialorder %v79_v24, %v81_v34  ;;  %v87_v43 = vcvt.f32.s32 %v81_v34 }
 0x105   :  { %v83_v37 = vsel %vm82_vm4, %v78_v35, inf }
 0x106   :  { %84 = vmin.xlane.f32.xlu1 %v83_v37  ;;  %116 = vadd.xlane.f32.xlu0 %v115_v36  ;;  %v88_v47 = vshll.u32 %v87_v43, 16 }
 0x107   :  { %v156_v54 = vpop.eup %155 }
 0x108   :  { %v119_v55 = vmul.f32 0.6931472, %v156_v54 }
 0x10a   :  { %v122_v56 = vadd.f32 %v119_v55, %v244_v11 }
 0x171   :  { %v70_v39 = vpop.xlane.xlu0 %69 }
 0x172   :  { %v71_v41 = vcvt.f32.s32 %v70_v39 }
 0x174   :  { %v74_v42 = vadd.s32 %v73_v40, %v71_v41 }
 0x176   :  { %vm90_vm5 = vcmp.eq.s32.totalorder %v48_v9, %v74_v42 }
 0x177   :  { %v92_v44 = vsel %vm90_vm5, %v43_v1, 0.0 }
 0x178   :  { %v94_v45 = vsel %vm49_vm0, %v92_v44, 0.0 }
 0x179   :  { %v85_v46 = vpop.xlane.xlu1 %84  ;;  %95 = vadd.xlane.f32.xlu1 %v94_v45  ;;  %v117_v53 = vpop.xlane.xlu0 %116 }
 0x17a   :  { %v86_v48 = vcvt.f32.s32 %v85_v46  ;;  %157 = vlog2.f32 %v117_v53 }
 0x17c   :  { %v89_v49 = vadd.s32 %v88_v47, %v86_v48 }
 0x17e   :  { %vm91_vm6 = vcmp.eq.s32.totalorder %v48_v9, %v89_v49 }
 0x17f   :  { %v93_v50 = vsel %vm91_vm6, %v44_v6, 0.0 }
 0x180   :  { %v97_v51 = vsel %vm49_vm0, %v93_v50, 0.0  ;;  %v158_v57 = vpop.eup %157 }
 0x181   :  { %98 = vadd.xlane.f32.xlu2 %v97_v51  ;;  %v121_v60 = vmul.f32 0.6931472, %v158_v57 }
 0x183   :  { %v123_v63 = vadd.f32 %v121_v60, %v105_v25 }
 0x1ec   :  { %v96_v58 = vpop.xlane.xlu1 %95 }
 0x1ed   :  { %v124_v59 = vsub.f32 %v122_v56, %v96_v58 }
 0x1ef   :  { %v126_v61 = vsub.f32 0.0, %v124_v59 }
 0x1f1   :  { %v128_v62 = vmul.f32 1.442695, %v126_v61 }
 0x1f3   :  { %159 = vpow2.f32 %v128_v62 }
 0x1f4   :  { %v99_v0 = vpop.xlane.xlu2 %98 }
 0x1f5   :  { %v125_v1 = vsub.f32 %v123_v63, %v99_v0 }
 0x1f7   :  { %v127_v2 = vsub.f32 0.0, %v125_v1 }
 0x1f9   :  { %v160_v3 = vpop.eup %159  ;;  %v130_v4 = vmul.f32 1.442695, %v127_v2 }
 0x1fa   :  { %v132_v5 = vsub.f32 1.0, %v160_v3 }
 0x1fb   :  { %161 = vpow2.f32 %v130_v4 }
 0x1fc   :  { %v134_v6 = vmul.f32 %v132_v5, %v132_v5 }
 0x1fe   :  { %v136_v7 = vmul.f32 %v134_v6, %v124_v59 }
 0x200   :  { %139 = vst.msk [vmem:[%s262_s2] sm:$0xff] %vm138_vm7, %v136_v7 }
 0x201   :  { %v162_v8 = vpop.eup %161 }
 0x202   :  { %v133_v9 = vsub.f32 1.0, %v162_v8 }
 0x204   :  { %v135_v10 = vmul.f32 %v133_v9, %v133_v9 }
 0x206   :  { %v137_v11 = vmul.f32 %v135_v10, %v125_v1 }
 0x208   :  { %140 = vst.msk [vmem:[%s262_s2 + $0x8] sm:$0xff] %vm138_vm7, %v137_v11 }
 0x209   :  { %145 = vsyncpa [#allocation3], 1 }
 0x20a   :  { %146 = vsyncpa [#allocation5], 1 }

</bundles_post_ra>
